<compile_context>
chip_gen: v6e
topology: v6e:2x2x1
jax: 0.10.0
libtpu: 0.0.40
codegen_flags: <defaults>
</compile_context>

<pallas_src>
import functools

import jax
import jax.numpy as jnp
from jax.experimental import pallas as pl
from jax.experimental.pallas import tpu as pltpu


# Branch order matches the PyTorch concat order (is_1dkernel=True, is_2dkernel=True).
BRANCHES = (("3x1", (3, 1)), ("5x1", (5, 1)), ("1x3", (1, 3)), ("3x3", (3, 3)))
_BN_EPS = 1e-5


# ----------------------------------------------------------------------------------
# Kernel
# ----------------------------------------------------------------------------------
def _inception_kernel(x_ref, mask_ref, wred_ref, sred_ref, wtap_ref, stap_ref,
                      o_ref, stk_ref, *, n_lanes, mar, c1_rows, branch_info):
    N = n_lanes
    x = x_ref[0]                                        # (2*Cin, N)

    # GEMM1: fused 1x1 branch + four 1x1 reduces (+ folded bias/BN), one relu, and
    # one mask multiply re-creating the convs' zero padding at the pad lanes.
    red = jnp.dot(wred_ref[...], x, preferred_element_type=jnp.float32)
    red = jnp.maximum(red + sred_ref[...], 0.0) * mask_ref[...]      # (R_red, N)

    # 1x1 branch -> output rows [0, c1_rows): one 8-aligned, full-width store.
    o_ref[0, 0:c1_rows, :] = red[0:c1_rows].astype(o_ref.dtype)

    # Build the tap-stacked activation: row-block (branch, tap) holds that branch's
    # reduce output shifted by the tap's flattened spatial offset, realized as a
    # write at a static lane offset into the margin-padded scratch (margin `mar` is
    # a multiple of 128 so the GEMM slab read below is lane-aligned).
    # Slab lanes a given tap's write does not cover only ever feed discarded
    # (spatial-pad) output columns, so the scratch never needs zero-initialisation.
    for row0, cr2, k_off, offsets in branch_info:
        y = red[row0:row0 + cr2]                        # (cr2, N), 8-aligned slice
        for t, off in enumerate(offsets):
            dst = k_off + t * cr2
            stk_ref[dst:dst + cr2, mar - off:mar - off + N] = y

    # GEMM2: all four kh x kw convs as one block-structured GEMM (+ folded bias/BN).
    tap = jnp.dot(wtap_ref[...], stk_ref[:, mar:mar + N],
                  preferred_element_type=jnp.float32)
    tap = jnp.maximum(tap + stap_ref[...], 0.0)
    o_ref[0, c1_rows:c1_rows + tap.shape[0], :] = tap.astype(o_ref.dtype)


# ----------------------------------------------------------------------------------
# Host-side parameter folding (complex conv + bias + eval-mode BN -> tap GEMM + shift)
# ----------------------------------------------------------------------------------
def _fold_block(p, eps=_BN_EPS):
    wr, br, wi, bi = p["wr"], p["br"], p["wi"], p["bi"]
    g_r, beta_r, m_r, v_r = p["bn_r"]
    g_i, beta_i, m_i, v_i = p["bn_i"]
    c_out, c_in, kh, kw = wr.shape

    sc_r = g_r / jnp.sqrt(v_r + eps)
    sc_i = g_i / jnp.sqrt(v_i + eps)

    A = wr.transpose(2, 3, 0, 1).reshape(kh * kw, c_out, c_in)
    B_ = wi.transpose(2, 3, 0, 1).reshape(kh * kw, c_out, c_in)
    w_blk = jnp.concatenate(
        [jnp.concatenate([A, -B_], axis=2),      # real-output rows
         jnp.concatenate([B_, A], axis=2)],      # imag-output rows
        axis=1)                                  # (T, 2*Cout, 2*Cin)

    bias = jnp.concatenate([br - bi, br + bi])                       # (2*Cout,)
    scale = jnp.concatenate([sc_r, sc_i])
    shift = jnp.concatenate([beta_r - m_r * sc_r, beta_i - m_i * sc_i])

    w_f = w_blk * scale[None, :, None]
    s_f = (bias * scale + shift).reshape(-1, 1)                      # (2*Cout, 1)
    return w_f, s_f


def _full_spec(a):
    zeros = (0,) * a.ndim
    return pl.BlockSpec(a.shape, lambda *_: zeros)


# ----------------------------------------------------------------------------------
# Wrapper
# ----------------------------------------------------------------------------------
def complex_inception_block(x, blocks, batch_tile=None):
    """x: (B, C_in, H, W, 2) float32. Returns (B, C_total, H, W, 2)."""
    B, c_in, H, W, two = x.shape
    assert two == 2

    # Global explicit spatial padding covering every branch's reach.
    kerns = [(1, 1)] + [k for _, k in BRANCHES]
    PH = max((kh - 1) // 2 for kh, kw in kerns)
    PW = max((kw - 1) // 2 for kh, kw in kerns)
    Hp, Wp = H + 2 * PH, W + 2 * PW
    seg = Hp * Wp

    # Fold `bt` images into the lane dim per grid step, but keep >=2 grid steps when
    # possible so both v7x TensorCores get work ("parallel" grid axis).
    if batch_tile is None:
        bt = max(1, B // 2)
    else:
        bt = max(1, min(int(batch_tile), B))
    G = -(-B // bt)
    Bp = G * bt
    n_lanes = bt * seg

    # Lane margin of the tap-stacking scratch: >= max tap offset, multiple of 128.
    max_off = PH * Wp + PW
    mar = max(128, ((max_off + 127) // 128) * 128)

    # ---- activations: complex channel rows, explicitly padded spatial lanes ------
    xr = jnp.concatenate([x[..., 0], x[..., 1]], axis=1)             # (B, 2Cin, H, W)
    xr = jnp.pad(xr, ((0, Bp - B), (0, 0), (PH, PH), (PW, PW)))
    xr = (xr.reshape(G, bt, 2 * c_in, seg)
            .transpose(0, 2, 1, 3)
            .reshape(G, 2 * c_in, n_lanes))

    # 0/1 mask of valid (non-pad) lanes.
    m2d = jnp.pad(jnp.ones((H, W), jnp.float32), ((PH, PH), (PW, PW)))
    mask = jnp.tile(m2d.reshape(1, seg), (1, bt))                    # (1, n_lanes)

    # ---- fold params into one reduce GEMM + one block-structured tap GEMM --------
    w1, s1 = _fold_block(blocks["1x1"][0])
    red_w, red_s = [w1[0]], [s1]
    c_list = [w1.shape[1] // 2]
    c1_rows = w1.shape[1]                                            # 2 * c_out['1x1']

    branch_info, tap_blocks = [], []
    row0, k_off, m_off = c1_rows, 0, 0
    for name, (kh, kw) in BRANCHES:
        p_red, p_conv = blocks[name]
        wr, sr = _fold_block(p_red)                                  # (1, 2Cr, 2Cin)
        wk, sk = _fold_block(p_conv)                                 # (T, 2Cout, 2Cr)
        red_w.append(wr[0]); red_s.append(sr)
        cr2, co2 = wr.shape[1], wk.shape[1]
        ph, pw = (kh - 1) // 2, (kw - 1) // 2
        offs = tuple((dy - ph) * Wp + (dx - pw)
                     for dy in range(kh) for dx in range(kw))
        branch_info.append((row0, cr2, k_off, offs))
        tap_blocks.append((m_off, k_off, wk, sk))
        c_list.append(co2 // 2)
        row0 += cr2
        k_off += len(offs) * cr2
        m_off += co2

    w_red = jnp.concatenate(red_w, axis=0)                           # (R_red, 2Cin)
    s_red = jnp.concatenate(red_s, axis=0)                           # (R_red, 1)
    K_tot, M_tap = k_off, m_off

    w_tap = jnp.zeros((M_tap, K_tot), jnp.float32)
    s_tap_parts = []
    for (mo, ko, wk, sk), (_, cr2, _, offs) in zip(tap_blocks, branch_info):
        T, co2 = len(offs), wk.shape[1]
        blk = jnp.transpose(wk, (1, 0, 2)).reshape(co2, T * cr2)     # (2Cout, T*2Cr)
        w_tap = w_tap.at[mo:mo + co2, ko:ko + T * cr2].set(blk)
        s_tap_parts.append(sk)
    s_tap = jnp.concatenate(s_tap_parts, axis=0)                     # (M_tap, 1)

    c_total = sum(c_list)
    out_rows = 2 * c_total                                           # c1_rows + M_tap

    kernel = functools.partial(_inception_kernel, n_lanes=n_lanes, mar=mar,
                               c1_rows=c1_rows, branch_info=tuple(branch_info))

    out = pl.pallas_call(
        kernel,
        out_shape=jax.ShapeDtypeStruct((G, out_rows, n_lanes), x.dtype),
        grid_spec=pltpu.PrefetchScalarGridSpec(
            num_scalar_prefetch=0,
            grid=(G,),
            in_specs=[
                pl.BlockSpec((1, 2 * c_in, n_lanes), lambda g: (g, 0, 0)),
                _full_spec(mask), _full_spec(w_red), _full_spec(s_red),
                _full_spec(w_tap), _full_spec(s_tap),
            ],
            out_specs=pl.BlockSpec((1, out_rows, n_lanes), lambda g: (g, 0, 0)),
            scratch_shapes=[pltpu.VMEM((K_tot, n_lanes + 2 * mar), jnp.float32)],
        ),
        compiler_params=pltpu.CompilerParams(
            dimension_semantics=("parallel",),
            vmem_limit_bytes=32 * 1024 * 1024),
    )(xr, mask, w_red, s_red, w_tap, s_tap)

    # ---- un-pad lanes, restore (B, C, H, W); branch-major -> real-then-imag order -
    out = out.reshape(G, out_rows, bt, seg).transpose(0, 2, 1, 3)
    out = out.reshape(Bp, out_rows, Hp, Wp)[:B, :, PH:PH + H, PW:PW + W]

    real_idx, imag_idx, off = [], [], 0
    for cb in c_list:
        real_idx += list(range(off, off + cb))
        imag_idx += list(range(off + cb, off + 2 * cb))
        off += 2 * cb
    real_idx = jnp.asarray(real_idx)
    imag_idx = jnp.asarray(imag_idx)
    return jnp.stack([out[:, real_idx], out[:, imag_idx]], axis=-1)


# ----------------------------------------------------------------------------------
# Pure-JAX reference (independent path: lax.conv + explicit BN) for verification
# ----------------------------------------------------------------------------------
def _conv2d(x, w, b, pad):
    y = jax.lax.conv_general_dilated(
        x, w, window_strides=(1, 1),
        padding=((pad[0], pad[0]), (pad[1], pad[1])),
        dimension_numbers=("NCHW", "OIHW", "NCHW"))
    return y + b[None, :, None, None]


def _bn(x, bn, eps=_BN_EPS):
    g, b, m, v = bn
    return ((x - m[None, :, None, None]) / jnp.sqrt(v[None, :, None, None] + eps)
            * g[None, :, None, None] + b[None, :, None, None])


def _ref_block(xr, xi, p, pad):
    yr = _conv2d(xr, p["wr"], p["br"], pad) - _conv2d(xi, p["wi"], p["bi"], pad)
    yi = _conv2d(xi, p["wr"], p["br"], pad) + _conv2d(xr, p["wi"], p["bi"], pad)
    return jnp.maximum(_bn(yr, p["bn_r"]), 0.0), jnp.maximum(_bn(yi, p["bn_i"]), 0.0)


def _reference(x, blocks):
    xr, xi = x[..., 0], x[..., 1]
    yr, yi = _ref_block(xr, xi, blocks["1x1"][0], (0, 0))
    outs_r, outs_i = [yr], [yi]
    for name, (kh, kw) in BRANCHES:
        p_red, p_conv = blocks[name]
        zr, zi = _ref_block(xr, xi, p_red, (0, 0))
        yr, yi = _ref_block(zr, zi, p_conv, ((kh - 1) // 2, (kw - 1) // 2))
        outs_r.append(yr)
        outs_i.append(yi)
    return jnp.stack([jnp.concatenate(outs_r, axis=1),
                      jnp.concatenate(outs_i, axis=1)], axis=-1)


# ----------------------------------------------------------------------------------
# Deterministic parameter construction
# ----------------------------------------------------------------------------------
def _make_block(key, c_in, c_out, kh, kw):
    ks = jax.random.split(key, 12)
    lim = 1.0 / jnp.sqrt(float(c_in * kh * kw))

    def u(k, shape):
        return jax.random.uniform(k, shape, jnp.float32, -lim, lim)

    def bn(k0, k1, k2, k3):
        return (1.0 + 0.1 * jax.random.normal(k0, (c_out,), jnp.float32),   # gamma
                0.1 * jax.random.normal(k1, (c_out,), jnp.float32),          # beta
                0.1 * jax.random.normal(k2, (c_out,), jnp.float32),          # running mean
                1.0 + 0.2 * jax.random.uniform(k3, (c_out,), jnp.float32))   # running var

    return {
        "wr": u(ks[0], (c_out, c_in, kh, kw)), "br": u(ks[1], (c_out,)),
        "wi": u(ks[2], (c_out, c_in, kh, kw)), "bi": u(ks[3], (c_out,)),
        "bn_r": bn(ks[4], ks[5], ks[6], ks[7]),
        "bn_i": bn(ks[8], ks[9], ks[10], ks[11]),
    }


if __name__ == "__main__":
    key = jax.random.PRNGKey(0)
    B, c_in, H, W = 2, 4, 16, 16
    c_red = {"3x1": 4, "5x1": 4, "1x3": 4, "3x3": 4}
    c_out = {"1x1": 4, "3x1": 4, "5x1": 4, "1x3": 4, "3x3": 4}

    keys = jax.random.split(key, 10)
    x = jax.random.normal(keys[0], (B, c_in, H, W, 2), jnp.float32)

    blocks = {
        "1x1": [_make_block(keys[1], c_in, c_out["1x1"], 1, 1)],
        "3x1": [_make_block(keys[2], c_in, c_red["3x1"], 1, 1),
                _make_block(keys[3], c_red["3x1"], c_out["3x1"], 3, 1)],
        "5x1": [_make_block(keys[4], c_in, c_red["5x1"], 1, 1),
                _make_block(keys[5], c_red["5x1"], c_out["5x1"], 5, 1)],
        "1x3": [_make_block(keys[6], c_in, c_red["1x3"], 1, 1),
                _make_block(keys[7], c_red["1x3"], c_out["1x3"], 1, 3)],
        "3x3": [_make_block(keys[8], c_in, c_red["3x3"], 1, 1),
                _make_block(keys[9], c_red["3x3"], c_out["3x3"], 3, 3)],
    }

    out = complex_inception_block(x, blocks)
    out = jax.block_until_ready(out)

    ref = _reference(x, blocks)
    assert out.shape == ref.shape == (B, sum(c_out.values()), H, W, 2)
    assert bool(jnp.allclose(out, ref, atol=1e-4, rtol=1e-4))

    print("KERNEL_OK")
</pallas_src>

<mosaic_0001>
module attributes {stable_mosaic.version = 11 : i64} {
  func.func @_inception_kernel(%arg0: i32, %arg1: memref<1x8x360xf32, #tpu.memory_space<vmem>>, %arg2: memref<1x360xf32, #tpu.memory_space<vmem>>, %arg3: memref<40x8xf32, #tpu.memory_space<vmem>>, %arg4: memref<40x1xf32, #tpu.memory_space<vmem>>, %arg5: memref<32x160xf32, #tpu.memory_space<vmem>>, %arg6: memref<32x1xf32, #tpu.memory_space<vmem>>, %arg7: memref<1x40x360xf32, #tpu.memory_space<vmem>>, %arg8: memref<160x616xf32, #tpu.memory_space<vmem>>) attributes {dimension_semantics = [#tpu.dimension_semantics<parallel>], iteration_bounds = array<i64: 2>, scalar_prefetch = 0 : i64, scratch_operands = 1 : i64, tpu.core_type = #tpu.core_type<tc>, window_params = [{transform_indices = @transform_0, window_bounds = array<i64: 1, 8, 360>}, {pipeline_mode = #tpu.pipeline_mode<synchronous>, transform_indices = @transform_1, window_bounds = array<i64: 1, 360>}, {pipeline_mode = #tpu.pipeline_mode<synchronous>, transform_indices = @transform_2, window_bounds = array<i64: 40, 8>}, {pipeline_mode = #tpu.pipeline_mode<synchronous>, transform_indices = @transform_3, window_bounds = array<i64: 40, 1>}, {pipeline_mode = #tpu.pipeline_mode<synchronous>, transform_indices = @transform_4, window_bounds = array<i64: 32, 160>}, {pipeline_mode = #tpu.pipeline_mode<synchronous>, transform_indices = @transform_5, window_bounds = array<i64: 32, 1>}, {transform_indices = @transform_6, window_bounds = array<i64: 1, 40, 360>}]} {
    %c0 = arith.constant 0 : index
    %c0_0 = arith.constant 0 : index
    %c0_1 = arith.constant 0 : index
    %0 = vector.load %arg1[%c0, %c0_0, %c0_1] : memref<1x8x360xf32, #tpu.memory_space<vmem>>, vector<1x8x360xf32>
    %1 = vector.shape_cast %0 : vector<1x8x360xf32> to vector<8x360xf32>
    %c0_2 = arith.constant 0 : index
    %c0_3 = arith.constant 0 : index
    %2 = vector.load %arg3[%c0_2, %c0_3] : memref<40x8xf32, #tpu.memory_space<vmem>>, vector<40x8xf32>
    %cst = arith.constant dense<0.000000e+00> : vector<40x360xf32>
    %3 = tpu.matmul %2, %1, %cst {dimension_numbers = #tpu.dot_dimension_numbers<[1], [0], [0], [1], [0, 0, 1, 1], [], []>} : vector<40x8xf32>, vector<8x360xf32>, vector<40x360xf32> -> vector<40x360xf32>
    %c0_4 = arith.constant 0 : index
    %c0_5 = arith.constant 0 : index
    %4 = vector.load %arg4[%c0_4, %c0_5] : memref<40x1xf32, #tpu.memory_space<vmem>>, vector<40x1xf32>
    %5 = vector.broadcast %4 : vector<40x1xf32> to vector<40x360xf32>
    %6 = arith.addf %3, %5 : vector<40x360xf32>
    %cst_6 = arith.constant 0.000000e+00 : f32
    %7 = vector.broadcast %cst_6 : f32 to vector<40x360xf32>
    %8 = arith.maximumf %6, %7 : vector<40x360xf32>
    %c0_7 = arith.constant 0 : index
    %c0_8 = arith.constant 0 : index
    %9 = vector.load %arg2[%c0_7, %c0_8] : memref<1x360xf32, #tpu.memory_space<vmem>>, vector<1x360xf32>
    %10 = vector.broadcast %9 : vector<1x360xf32> to vector<40x360xf32>
    %11 = arith.mulf %8, %10 : vector<40x360xf32>
    %12 = vector.extract_strided_slice %11 {offsets = [0, 0], sizes = [8, 360], strides = [1, 1]} : vector<40x360xf32> to vector<8x360xf32>
    %c0_9 = arith.constant 0 : index
    %c0_10 = arith.constant 0 : index
    %c0_11 = arith.constant 0 : index
    %13 = vector.load %arg7[%c0_9, %c0_10, %c0_11] : memref<1x40x360xf32, #tpu.memory_space<vmem>>, vector<1x8x360xf32>
    %14 = vector.shape_cast %13 : vector<1x8x360xf32> to vector<8x360xf32>
    %15 = vector.shape_cast %12 : vector<8x360xf32> to vector<1x8x360xf32>
    tpu.vector_store %arg7[%c0_9, %c0_10, %c0_11], %15 {strides = array<i32>} : memref<1x40x360xf32, #tpu.memory_space<vmem>>, vector<1x8x360xf32>,
    %16 = vector.extract_strided_slice %11 {offsets = [8, 0], sizes = [8, 360], strides = [1, 1]} : vector<40x360xf32> to vector<8x360xf32>
    %c0_12 = arith.constant 0 : index
    %c146 = arith.constant 146 : index
    %17 = vector.load %arg8[%c0_12, %c146] : memref<160x616xf32, #tpu.memory_space<vmem>>, vector<8x360xf32>
    tpu.vector_store %arg8[%c0_12, %c146], %16 {strides = array<i32>} : memref<160x616xf32, #tpu.memory_space<vmem>>, vector<8x360xf32>,
    %c8 = arith.constant 8 : index
    %c128 = arith.constant 128 : index
    %18 = vector.load %arg8[%c8, %c128] : memref<160x616xf32, #tpu.memory_space<vmem>>, vector<8x360xf32>
    tpu.vector_store %arg8[%c8, %c128], %16 {strides = array<i32>} : memref<160x616xf32, #tpu.memory_space<vmem>>, vector<8x360xf32>,
    %c16 = arith.constant 16 : index
    %c110 = arith.constant 110 : index
    %19 = vector.load %arg8[%c16, %c110] : memref<160x616xf32, #tpu.memory_space<vmem>>, vector<8x360xf32>
    tpu.vector_store %arg8[%c16, %c110], %16 {strides = array<i32>} : memref<160x616xf32, #tpu.memory_space<vmem>>, vector<8x360xf32>,
    %20 = vector.extract_strided_slice %11 {offsets = [16, 0], sizes = [8, 360], strides = [1, 1]} : vector<40x360xf32> to vector<8x360xf32>
    %c24 = arith.constant 24 : index
    %c164 = arith.constant 164 : index
    %21 = vector.load %arg8[%c24, %c164] : memref<160x616xf32, #tpu.memory_space<vmem>>, vector<8x360xf32>
    tpu.vector_store %arg8[%c24, %c164], %20 {strides = array<i32>} : memref<160x616xf32, #tpu.memory_space<vmem>>, vector<8x360xf32>,
    %c32 = arith.constant 32 : index
    %c146_13 = arith.constant 146 : index
    %22 = vector.load %arg8[%c32, %c146_13] : memref<160x616xf32, #tpu.memory_space<vmem>>, vector<8x360xf32>
    tpu.vector_store %arg8[%c32, %c146_13], %20 {strides = array<i32>} : memref<160x616xf32, #tpu.memory_space<vmem>>, vector<8x360xf32>,
    %c40 = arith.constant 40 : index
    %c128_14 = arith.constant 128 : index
    %23 = vector.load %arg8[%c40, %c128_14] : memref<160x616xf32, #tpu.memory_space<vmem>>, vector<8x360xf32>
    tpu.vector_store %arg8[%c40, %c128_14], %20 {strides = array<i32>} : memref<160x616xf32, #tpu.memory_space<vmem>>, vector<8x360xf32>,
    %c48 = arith.constant 48 : index
    %c110_15 = arith.constant 110 : index
    %24 = vector.load %arg8[%c48, %c110_15] : memref<160x616xf32, #tpu.memory_space<vmem>>, vector<8x360xf32>
    tpu.vector_store %arg8[%c48, %c110_15], %20 {strides = array<i32>} : memref<160x616xf32, #tpu.memory_space<vmem>>, vector<8x360xf32>,
    %c56 = arith.constant 56 : index
    %c92 = arith.constant 92 : index
    %25 = vector.load %arg8[%c56, %c92] : memref<160x616xf32, #tpu.memory_space<vmem>>, vector<8x360xf32>
    tpu.vector_store %arg8[%c56, %c92], %20 {strides = array<i32>} : memref<160x616xf32, #tpu.memory_space<vmem>>, vector<8x360xf32>,
    %26 = vector.extract_strided_slice %11 {offsets = [24, 0], sizes = [8, 360], strides = [1, 1]} : vector<40x360xf32> to vector<8x360xf32>
    %c64 = arith.constant 64 : index
    %c129 = arith.constant 129 : index
    %27 = vector.load %arg8[%c64, %c129] : memref<160x616xf32, #tpu.memory_space<vmem>>, vector<8x360xf32>
    tpu.vector_store %arg8[%c64, %c129], %26 {strides = array<i32>} : memref<160x616xf32, #tpu.memory_space<vmem>>, vector<8x360xf32>,
    %c72 = arith.constant 72 : index
    %c128_16 = arith.constant 128 : index
    %28 = vector.load %arg8[%c72, %c128_16] : memref<160x616xf32, #tpu.memory_space<vmem>>, vector<8x360xf32>
    tpu.vector_store %arg8[%c72, %c128_16], %26 {strides = array<i32>} : memref<160x616xf32, #tpu.memory_space<vmem>>, vector<8x360xf32>,
    %c80 = arith.constant 80 : index
    %c127 = arith.constant 127 : index
    %29 = vector.load %arg8[%c80, %c127] : memref<160x616xf32, #tpu.memory_space<vmem>>, vector<8x360xf32>
    tpu.vector_store %arg8[%c80, %c127], %26 {strides = array<i32>} : memref<160x616xf32, #tpu.memory_space<vmem>>, vector<8x360xf32>,
    %30 = vector.extract_strided_slice %11 {offsets = [32, 0], sizes = [8, 360], strides = [1, 1]} : vector<40x360xf32> to vector<8x360xf32>
    %c88 = arith.constant 88 : index
    %c147 = arith.constant 147 : index
    %31 = vector.load %arg8[%c88, %c147] : memref<160x616xf32, #tpu.memory_space<vmem>>, vector<8x360xf32>
    tpu.vector_store %arg8[%c88, %c147], %30 {strides = array<i32>} : memref<160x616xf32, #tpu.memory_space<vmem>>, vector<8x360xf32>,
    %c96 = arith.constant 96 : index
    %c146_17 = arith.constant 146 : index
    %32 = vector.load %arg8[%c96, %c146_17] : memref<160x616xf32, #tpu.memory_space<vmem>>, vector<8x360xf32>
    tpu.vector_store %arg8[%c96, %c146_17], %30 {strides = array<i32>} : memref<160x616xf32, #tpu.memory_space<vmem>>, vector<8x360xf32>,
    %c104 = arith.constant 104 : index
    %c145 = arith.constant 145 : index
    %33 = vector.load %arg8[%c104, %c145] : memref<160x616xf32, #tpu.memory_space<vmem>>, vector<8x360xf32>
    tpu.vector_store %arg8[%c104, %c145], %30 {strides = array<i32>} : memref<160x616xf32, #tpu.memory_space<vmem>>, vector<8x360xf32>,
    %c112 = arith.constant 112 : index
    %c129_18 = arith.constant 129 : index
    %34 = vector.load %arg8[%c112, %c129_18] : memref<160x616xf32, #tpu.memory_space<vmem>>, vector<8x360xf32>
    tpu.vector_store %arg8[%c112, %c129_18], %30 {strides = array<i32>} : memref<160x616xf32, #tpu.memory_space<vmem>>, vector<8x360xf32>,
    %c120 = arith.constant 120 : index
    %c128_19 = arith.constant 128 : index
    %35 = vector.load %arg8[%c120, %c128_19] : memref<160x616xf32, #tpu.memory_space<vmem>>, vector<8x360xf32>
    tpu.vector_store %arg8[%c120, %c128_19], %30 {strides = array<i32>} : memref<160x616xf32, #tpu.memory_space<vmem>>, vector<8x360xf32>,
    %c128_20 = arith.constant 128 : index
    %c127_21 = arith.constant 127 : index
    %36 = vector.load %arg8[%c128_20, %c127_21] : memref<160x616xf32, #tpu.memory_space<vmem>>, vector<8x360xf32>
    tpu.vector_store %arg8[%c128_20, %c127_21], %30 {strides = array<i32>} : memref<160x616xf32, #tpu.memory_space<vmem>>, vector<8x360xf32>,
    %c136 = arith.constant 136 : index
    %c111 = arith.constant 111 : index
    %37 = vector.load %arg8[%c136, %c111] : memref<160x616xf32, #tpu.memory_space<vmem>>, vector<8x360xf32>
    tpu.vector_store %arg8[%c136, %c111], %30 {strides = array<i32>} : memref<160x616xf32, #tpu.memory_space<vmem>>, vector<8x360xf32>,
    %c144 = arith.constant 144 : index
    %c110_22 = arith.constant 110 : index
    %38 = vector.load %arg8[%c144, %c110_22] : memref<160x616xf32, #tpu.memory_space<vmem>>, vector<8x360xf32>
    tpu.vector_store %arg8[%c144, %c110_22], %30 {strides = array<i32>} : memref<160x616xf32, #tpu.memory_space<vmem>>, vector<8x360xf32>,
    %c152 = arith.constant 152 : index
    %c109 = arith.constant 109 : index
    %39 = vector.load %arg8[%c152, %c109] : memref<160x616xf32, #tpu.memory_space<vmem>>, vector<8x360xf32>
    tpu.vector_store %arg8[%c152, %c109], %30 {strides = array<i32>} : memref<160x616xf32, #tpu.memory_space<vmem>>, vector<8x360xf32>,
    %c0_23 = arith.constant 0 : index
    %c0_24 = arith.constant 0 : index
    %40 = vector.load %arg5[%c0_23, %c0_24] : memref<32x160xf32, #tpu.memory_space<vmem>>, vector<32x160xf32>
    %c0_25 = arith.constant 0 : index
    %c128_26 = arith.constant 128 : index
    %41 = vector.load %arg8[%c0_25, %c128_26] : memref<160x616xf32, #tpu.memory_space<vmem>>, vector<160x360xf32>
    %cst_27 = arith.constant dense<0.000000e+00> : vector<32x360xf32>
    %42 = tpu.matmul %40, %41, %cst_27 {dimension_numbers = #tpu.dot_dimension_numbers<[1], [0], [0], [1], [0, 0, 1, 1], [], []>} : vector<32x160xf32>, vector<160x360xf32>, vector<32x360xf32> -> vector<32x360xf32>
    %c0_28 = arith.constant 0 : index
    %c0_29 = arith.constant 0 : index
    %43 = vector.load %arg6[%c0_28, %c0_29] : memref<32x1xf32, #tpu.memory_space<vmem>>, vector<32x1xf32>
    %44 = vector.broadcast %43 : vector<32x1xf32> to vector<32x360xf32>
    %45 = arith.addf %42, %44 : vector<32x360xf32>
    %cst_30 = arith.constant 0.000000e+00 : f32
    %46 = vector.broadcast %cst_30 : f32 to vector<32x360xf32>
    %47 = arith.maximumf %45, %46 : vector<32x360xf32>
    %c0_31 = arith.constant 0 : index
    %c8_32 = arith.constant 8 : index
    %c0_33 = arith.constant 0 : index
    %48 = vector.load %arg7[%c0_31, %c8_32, %c0_33] : memref<1x40x360xf32, #tpu.memory_space<vmem>>, vector<1x32x360xf32>
    %49 = vector.shape_cast %48 : vector<1x32x360xf32> to vector<32x360xf32>
    %50 = vector.shape_cast %47 : vector<32x360xf32> to vector<1x32x360xf32>
    tpu.vector_store %arg7[%c0_31, %c8_32, %c0_33], %50 {strides = array<i32>} : memref<1x40x360xf32, #tpu.memory_space<vmem>>, vector<1x32x360xf32>,
    return
  }
  func.func @transform_0(%arg0: i32) -> (i32, i32, i32) {
    %c0_i32 = arith.constant 0 : i32
    %c0_i32_0 = arith.constant 0 : i32
    %c0_i32_1 = arith.constant 0 : i32
    return %arg0, %c0_i32, %c0_i32_0 : i32, i32, i32
  }
  func.func @transform_1(%arg0: i32) -> (i32, i32) {
    %c0_i32 = arith.constant 0 : i32
    %c0_i32_0 = arith.constant 0 : i32
    %c0_i32_1 = arith.constant 0 : i32
    return %c0_i32, %c0_i32_0 : i32, i32
  }
  func.func @transform_2(%arg0: i32) -> (i32, i32) {
    %c0_i32 = arith.constant 0 : i32
    %c0_i32_0 = arith.constant 0 : i32
    %c0_i32_1 = arith.constant 0 : i32
    return %c0_i32, %c0_i32_0 : i32, i32
  }
  func.func @transform_3(%arg0: i32) -> (i32, i32) {
    %c0_i32 = arith.constant 0 : i32
    %c0_i32_0 = arith.constant 0 : i32
    %c0_i32_1 = arith.constant 0 : i32
    return %c0_i32, %c0_i32_0 : i32, i32
  }
  func.func @transform_4(%arg0: i32) -> (i32, i32) {
    %c0_i32 = arith.constant 0 : i32
    %c0_i32_0 = arith.constant 0 : i32
    %c0_i32_1 = arith.constant 0 : i32
    return %c0_i32, %c0_i32_0 : i32, i32
  }
  func.func @transform_5(%arg0: i32) -> (i32, i32) {
    %c0_i32 = arith.constant 0 : i32
    %c0_i32_0 = arith.constant 0 : i32
    %c0_i32_1 = arith.constant 0 : i32
    return %c0_i32, %c0_i32_0 : i32, i32
  }
  func.func @transform_6(%arg0: i32) -> (i32, i32, i32) {
    %c0_i32 = arith.constant 0 : i32
    %c0_i32_0 = arith.constant 0 : i32
    %c0_i32_1 = arith.constant 0 : i32
    return %arg0, %c0_i32, %c0_i32_0 : i32, i32, i32
  }
}

</mosaic_0001>

<bundles_post_ra>
// kernel: tpu_custom_call.1
= control target key start
LH: loop header
LB: loop body
LE: loop exit
PB: predicated region body
PF: predicated region fallthrough
CT: control target
= control target key end

     0   :  { %11 = vsyncpa [#allocation4], 0  ;;  %s1872_s0 = inlined_call_operand.vmem [shape: f32[2,8,360], index: 0, kind: input, shape index: {}]   ;;  %s1873_s1 = inlined_call_operand.vmem [shape: f32[1,360], index: 1, kind: input, shape index: {}]   ;;  %s1874_s2 = inlined_call_operand.vmem [shape: f32[40,8], index: 2, kind: input, shape index: {}]   ;;  %s1875_s3 = inlined_call_operand.vmem [shape: f32[40,1], index: 3, kind: input, shape index: {}]   ;;  %s1876_s4 = inlined_call_operand.vmem [shape: f32[32,160], index: 4, kind: input, shape index: {}]   ;;  %s1877_s5 = inlined_call_operand.vmem [shape: f32[32,1], index: 5, kind: input, shape index: {}]   ;;  %s1878_s6 = inlined_call_operand.hbm [shape: f32[2,40,360], index: 6, kind: output, shape index: {}]  }
   0x1   :  { %13 = vsyncpa [#allocation4 + $0x1], 0  ;;  %s1436_s21 = smov 0   ;;  %s1438_s22 = smov 0  }
   0x2   :  { %s1440_s23 = smov 0   ;;  %s1442_s24 = smov 0  }
   0x3 LB: > { %s1457_s25 = sadd.s32 4294967295, %s1383_s24   ;;  %s1215_s26 = sadd.s32 4294967294, %s1383_s24   ;;  %s1383_s24 = sphi %s1442_s24, %s1890_s24   ;;  %s1379_s23 = sphi %s1440_s23, %s1889_s23   ;;  %s1375_s22 = sphi %s1438_s22, %s1888_s22   ;;  %s1371_s21 = sphi %s1436_s21, %s1887_s21  }
   0x4   : > { %s1461_s27 = sadd.s32 1, %s1383_s24   ;;  %s157_s28 = sadd.s32 1, %s1379_s23 }
   0x5   : > { %s154_s29 = ssub.s32 %s1383_s24, %s1461_s27  ;;  %p167_p0 = scmp.ne.s32.totalorder %s1379_s23, %s1375_s22 }
   0x6   : > { %p155_p1 = scmp.eq.s32.totalorder %s154_s29, 0  ;;  %p168_p2 = scmp.eq.s32.totalorder %s1457_s25, 1 }
   0x7   : > { %p173_p3 = scmp.ne.s32.totalorder %s1375_s22, %s1371_s21  ;;  %p174_p4 = scmp.eq.s32.totalorder %s1215_s26, 1 }
   0x8   : > { %s1472_s30 = scalar_select %p155_p1, %s1379_s23, %s157_s28  }
   0x9   : > { %p1474_p5 = por %p168_p2, %p167_p0  ;;  %p1478_p6 = por %p174_p4, %p173_p3 }
   0xa   : > { %p1218_p7 = scmp.ge.s32.totalorder %s1383_s24, 1  ;;  %p215_p8 = scmp.lt.s32.totalorder %s1383_s24, 3 }
   0xc   : > { %p216_p9 = pnand %p1218_p7, %p215_p8 }
   0xd   : > { %p245_p10 = scmp.lt.s32.totalorder (!%p216_p9), %s1457_s25, 1  ;;  %s1389_s20 = smov (!%p216_p9), 92  }
   0xe   : > { %219 = sbr.rel (%p216_p9) target bundleno = 670 (0x29e), region = 44  ;;  %s1390_s26 = smov (!%p216_p9), 18  }
   0xf   : > { %s1391_s28 = smov (!%p216_p9), 36   ;;  %s1392_s29 = smov (!%p216_p9), 127  }
  0x10   : > { %s1394_s10 = smov (!%p216_p9), 19   ;;  %s1395_s11 = smov (!%p216_p9), 17  }
  0x11   : > { %s1396_s12 = smov (!%p216_p9), 109   ;;  %s1397_s13 = smov (!%p216_p9), 111  }
  0x13   : > { %v1385_v0 = vmov 0.0   ;;  %vm1386_vm0 = vmmov 0   ;;  %s246_s9 = scalar_select %p245_p10, %s1457_s25, 1  ;;  %v1387_v1 = vmov 0   ;;  %v260_v2 = vld [vmem:[%s1875_s3 + $0x10] sm:$0xff]  ;;  %v262_v3 = vld [vmem:[%s1875_s3 + $0x20] sm:$0xff]  ;;  %v506_v14 = vlaneseq }
  0x14   : > { %1247 = vmatprep.subr.mxu1 %v1385_v0  ;;  %1249 = vmatprep.mubr.msk.f32.mxu1 %vm1386_vm0, %v1385_v0  ;;  %v259_v4 = vld [vmem:[%s1875_s3 + $0x8] sm:$0xff]  ;;  %v253_v5 = vld [vmem:[%s1874_s2] sm:$0xff]  ;;  %vm288_vm1 = vcmask 64512   ;;  %v261_v9 = vld [vmem:[%s1875_s3 + $0x18] sm:$0xff]  ;;  %vm1879_vm2 = vcmask 850944   ;;  %vm928_vm3 = vcmask 261120  }
  0x15   : > { %368 = vmatprep.mubr.f32.mxu0 %v1385_v0  ;;  %1322 = vset.pattern.permute.xlu1 %v1387_v1  ;;  %s1265_s14 = smul.u32 24, %s246_s9  ;;  %v254_v10 = vld [vmem:[%s1874_s2 + $0x8] sm:$0xff]  ;;  %v255_v11 = vld [vmem:[%s1874_s2 + $0x10] sm:$0xff]  ;;  %v256_v12 = vld [vmem:[%s1874_s2 + $0x18] sm:$0xff]  ;;  %v507_v15 = vshrl.u32 %v506_v14, 7  ;;  %s1393_s9 = smov 1  }
  0x16   : > { %275 = vperm.xlu1 %1322, %v260_v2   ;;  %1321 = vset.pattern.permute.xlu0 %v1387_v1  ;;  %v257_v13 = vld [vmem:[%s1874_s2 + $0x20] sm:$0xff]  ;;  %vm580_vm4 = vcmask 703488   ;;  %vm654_vm5 = vcmask 556032   ;;  %vm569_vm6 = vcmask 900096   ;;  %vm555_vm7 = vcmask 1047696  }
  0x17   : > { %285 = vperm.xlu0 %1321, %v262_v3   ;;  %s249_s19 = scalar_lea.vmem %s1872_s0, %s1265_s14  ;;  %v516_v19 = vsub.s32 2, %v507_v15  ;;  %v504_v21 = vld [vmem:[%s1873_s1] sm:$0x7]  ;;  %v508_v22 = vsub.s32 0, %v507_v15  ;;  %v512_v27 = vsub.s32 1, %v507_v15  ;;  %vm643_vm8 = vcmask 752640  }
  0x18   : > { %v251_v6 = vld [vmem:[%s249_s19 + $0x8] sm:$0xff]  ;;  %v252_v7 = vld [vmem:[%s249_s19 + $0x10] sm:$0xff]  ;;  %v250_v8 = vld [vmem:[%s249_s19] sm:$0xff]  ;;  %s1388_s19 = smov 110   ;;  %vm598_vm9 = vcmask 1047840   ;;  %vm696_vm10 = vcmask 842752  }
  0x19   : > { %334 = vmatprep.subr.mxu0 %v251_v6  ;;  %1248 = vmatpush3.msra.mxu1 %v252_v7  ;;  %v1554_v29 = vrot.slane %v504_v21, %v516_v19  ;;  %v1556_v32 = vrot.slane %v504_v21, %v508_v22  ;;  %v1558_v38 = vrot.slane %v504_v21, %v512_v27  ;;  %v905_v27 = vld [vmem:[%s1877_s5 + $0x8] sm:$0xff]  ;;  %vm549_vm11 = vcmask 146432  }
  0x1a   : > { %270 = vperm.xlu1 %1322, %v259_v4   ;;  %335 = vmatpush1.msra.mxu0 %v250_v8  ;;  %vm558_vm12 = vcmask 998400   ;;  %vm591_vm13 = vcmask 293888   ;;  %vm665_vm14 = vcmask 7168   ;;  %vm674_vm15 = vcmask 859136  }
  0x1b   : > { %1250 = vmatmul.mubr.msk.f32.vlgmr.msra.gmra.mxu1 %vm288_vm1, %v253_v5  ;;  %1220 = vmatmul.mubr.msk.f32.vlgmr.msra.gmra.mxu0 %vm288_vm1, %v253_v5 }
  0x1c   : > { %1252 = vmatprep.mubr.msk.f32.mxu1 %vm1386_vm0, %v1385_v0  ;;  %374 = vmatprep.mubr.f32.mxu0 %v1385_v0 }
  0x1d   : > { %280 = vperm.xlu0 %1321, %v261_v9   ;;  %1030 = vmatprep.subr.mxu1 %v1385_v0 }
  0x1f   : > { %1253 = vmatmul.mubr.msk.f32.gmra.mxu1 %vm288_vm1, %v254_v10  ;;  %1221 = vmatmul.mubr.msk.f32.gmra.mxu0 %vm288_vm1, %v254_v10 }
  0x20   : > { %1255 = vmatprep.mubr.msk.f32.mxu1 %vm1386_vm0, %v1385_v0  ;;  %380 = vmatprep.mubr.f32.mxu0 %v1385_v0 }
  0x23   : > { %1256 = vmatmul.mubr.msk.f32.gmra.mxu1 %vm288_vm1, %v255_v11  ;;  %1222 = vmatmul.mubr.msk.f32.gmra.mxu0 %vm288_vm1, %v255_v11 }
  0x24   : > { %1258 = vmatprep.mubr.msk.f32.mxu1 %vm1386_vm0, %v1385_v0  ;;  %386 = vmatprep.mubr.f32.mxu0 %v1385_v0 }
  0x27   : > { %1259 = vmatmul.mubr.msk.f32.gmra.mxu1 %vm288_vm1, %v256_v12  ;;  %1223 = vmatmul.mubr.msk.f32.gmra.mxu0 %vm288_vm1, %v256_v12 }
  0x28   : > { %1261 = vmatprep.mubr.msk.f32.mxu1 %vm1386_vm0, %v1385_v0  ;;  %392 = vmatprep.mubr.f32.mxu0 %v1385_v0  ;;  %vm671_vm0 = vcmask 1047560  }
  0x2b   : > { %1262 = vmatmul.mubr.msk.f32.gmra.mxu1 %vm288_vm1, %v257_v13  ;;  %1224 = vmatmul.mubr.msk.f32.gmra.mxu0 %vm288_vm1, %v257_v13  ;;  %vm685_vm1 = vcmask 1039360  }
  0x91   : > { %v276_v16 = vpop.permute.xlu1 %275 }
  0x92   : > { %v1552_v24 = vpop.permute.xlu0 %285 }
  0x95   : > { %v271_v25 = vpop.permute.xlu1 %270 }
  0x98   : > { %v281_v47 = vpop.permute.xlu0 %280 }
  0xdb   : > { %v1543_v17 = vpop.f32.mrf.mxu1  ;;  %v1545_v18 = vpop.f32.mrf.mxu0 }
  0xdd   : > { %v1251_v20 = vpop.f32.mrf.mxu1  ;;  %v1550_v23 = vpop.f32.mrf.mxu0 }
  0xdf   : > { %v470_v26 = vpop.f32.mrf.mxu1  ;;  %v376_v30 = vpop.f32.mrf.mxu0 }
  0xe0   : > { %v471_v28 = vadd.f32 %v470_v26, %v271_v25  ;;  %v377_v31 = vadd.f32 %v376_v30, %v271_v25  ;;  %v904_v26 = vld [vmem:[%s1877_s5] sm:$0xff]  ;;  %v907_v30 = vld [vmem:[%s1877_s5 + $0x18] sm:$0xff] }
  0xe1   : > { %v1254_v33 = vpop.f32.mrf.mxu1  ;;  %v378_v35 = vpop.f32.mrf.mxu0 }
  0xe2   : > { %v494_v34 = vmax.f32 %v471_v28, 0.0  ;;  %v492_v36 = vmax.f32 %v377_v31, 0.0  ;;  %v379_v37 = vadd.f32 %v378_v35, %v271_v25  ;;  %v258_v25 = vld [vmem:[%s1875_s3] sm:$0xff]  ;;  %v906_v28 = vld [vmem:[%s1877_s5 + $0x10] sm:$0xff] }
  0xe3   : > { %v475_v39 = vpop.f32.mrf.mxu1  ;;  %v382_v42 = vpop.f32.mrf.mxu0 }
  0xe4   : > { %v1561_v40 = vmul.f32 %v1554_v29, %v494_v34  ;;  %v476_v41 = vadd.f32 %v475_v39, %v276_v16  ;;  %v1564_v43 = vmul.f32 %v1556_v32, %v492_v36  ;;  %v493_v44 = vmax.f32 %v379_v37, 0.0 }
  0xe5   : > { %v383_v45 = vadd.f32 %v382_v42, %v276_v16  ;;  %v1257_v46 = vpop.f32.mrf.mxu1  ;;  %v384_v49 = vpop.f32.mrf.mxu0 }
  0xe6   : > { %562 = vst.msk [vmem:[#allocation2 + $0x40] sm:$0xff] %vm1879_vm2, %v1561_v40  ;;  %v497_v48 = vmax.f32 %v476_v41, 0.0  ;;  %567 = vrot.lane.b32.xlu0 %v1561_v40, %s1388_s19  ;;  %v1571_v50 = vmul.f32 %v1558_v38, %v493_v44  ;;  %v385_v52 = vadd.f32 %v384_v49, %v276_v16  ;;  %563 = vrot.lane.b32.xlu1 %v1564_v43, %s1388_s19 }
  0xe7   : > { %v495_v51 = vmax.f32 %v383_v45, 0.0  ;;  %v480_v53 = vpop.f32.mrf.mxu1  ;;  %v388_v55 = vpop.f32.mrf.mxu0 }
  0xe8   : > { %v1576_v54 = vmul.f32 %v1554_v29, %v497_v48  ;;  %v481_v56 = vadd.f32 %v480_v53, %v281_v47  ;;  %v496_v58 = vmax.f32 %v385_v52, 0.0  ;;  %v389_v60 = vadd.f32 %v388_v55, %v281_v47 }
  0xe9   : > { %v1579_v57 = vmul.f32 %v1556_v32, %v495_v51  ;;  %v1260_v59 = vpop.f32.mrf.mxu1  ;;  %v390_v61 = vpop.f32.mrf.mxu0 }
  0xea   : > { %620 = vst.msk [vmem:[#allocation2 + $0xe0] sm:$0xff] %vm1879_vm2, %v1576_v54  ;;  %641 = vrot.lane.b32.xlu0 %v1576_v54, %s1389_s20  ;;  %v500_v62 = vmax.f32 %v481_v56, 0.0  ;;  %v1586_v63 = vmul.f32 %v1558_v38, %v496_v58  ;;  %565 = vrot.lane.b32.xlu1 %v1571_v50, %s1388_s19  ;;  %v391_v1 = vadd.f32 %v390_v61, %v281_v47  ;;  %v498_v2 = vmax.f32 %v389_v60, 0.0 }
  0xeb   : > { %v485_v3 = vpop.f32.mrf.mxu1  ;;  %v394_v4 = vpop.f32.mrf.mxu0 }
  0xec   : > { %v486_v5 = vadd.f32 %v485_v3, %v1552_v24  ;;  %v532_v6 = vmul.f32 %v1554_v29, %v500_v62  ;;  %v395_v7 = vadd.f32 %v394_v4, %v1552_v24  ;;  %v499_v8 = vmax.f32 %v391_v1, 0.0 }
  0xed   : > { %v1263_v9 = vpop.f32.mrf.mxu1  ;;  %v1594_v10 = vmul.f32 %v1556_v32, %v498_v2  ;;  %v396_v11 = vpop.f32.mrf.mxu0 }
  0xee   : > { %625 = vrot.lane.b32.xlu0 %v1576_v54, %s1388_s19  ;;  %v503_v12 = vmax.f32 %v486_v5, 0.0  ;;  %678 = vst.msk [vmem:[#allocation2 + $0x180] sm:$0xff] %vm1879_vm2, %v532_v6  ;;  %637 = vrot.lane.b32.xlu1 %v1579_v57, %s1389_s20  ;;  %v501_v13 = vmax.f32 %v395_v7, 0.0  ;;  %v397_v14 = vadd.f32 %v396_v11, %v1552_v24  ;;  %v1603_v15 = vmul.f32 %v1558_v38, %v499_v8  ;;  %v837_v24 = vld [vmem:[%s1876_s4 + $0x8] sm:$0xff] }
  0xef   : > { %1234 = vmatprep.mubr.msk.f32.mxu1 %vm928_vm3, %v837_v24  ;;  %1230 = vmatprep.mubr.msk.f32.mxu0 %vm928_vm3, %v837_v24 }
  0xf0   : > { %v535_v16 = vmul.f32 %v1554_v29, %v503_v12  ;;  %v533_v19 = vmul.f32 %v1556_v32, %v501_v13  ;;  %v502_v20 = vmax.f32 %v397_v14, 0.0 }
  0xf2   : > { %608 = vrot.lane.b32.xlu0 %v1576_v54, %s1390_s26  ;;  %765 = vst.msk [vmem:[#allocation2 + $0x270] sm:$0xff] %vm1879_vm2, %v535_v16  ;;  %v534_v21 = vmul.f32 %v1558_v38, %v502_v20  ;;  %621 = vrot.lane.b32.xlu1 %v1579_v57, %s1388_s19  ;;  %vm747_vm2 = vcmask 990208  }
  0xf4   : > { %941 = vmatprep.subr.mxu0 %v534_v21 }
  0xf5   : > { %942 = vmatpush1.msra.mxu0 %v533_v19 }
  0xf6   : > { %604 = vrot.lane.b32.xlu0 %v1579_v57, %s1390_s26  ;;  %639 = vrot.lane.b32.xlu1 %v1586_v63, %s1389_s20  ;;  %s1398_s20 = smov [#allocation3]  }
  0xf9   : > { %v891_v22 = vld [vmem:[#allocation2 + $0x270] sm:$0xff] }
  0xfa   : > { %585 = vrot.lane.b32.xlu0 %v1579_v57, %s1391_s28  ;;  %1031 = vmatpush1.msra.mxu1 %v891_v22 }
  0xfb   : > { %623 = vrot.lane.b32.xlu1 %v1586_v63, %s1388_s19  ;;  %1032 = vmatprep.subr.mxu1 %v1385_v0 }
  0xfe   : > { %683 = vrot.lane.b32.xlu0 %v532_v6, %s1392_s29 }
  0xff   : > { %606 = vrot.lane.b32.xlu1 %v1586_v63, %s1390_s26 }
 0x102   : > { %663 = vrot.lane.b32.xlu0 %v532_v6, %s1393_s9 }
 0x103   : > { %587 = vrot.lane.b32.xlu1 %v1586_v63, %s1391_s28 }
 0x106   : > { %661 = vrot.lane.b32.xlu0 %v1603_v15, %s1393_s9 }
 0x107   : > { %679 = vrot.lane.b32.xlu1 %v1594_v10, %s1392_s29 }
 0x10a   : > { %753 = vrot.lane.b32.xlu0 %v535_v16, %s1393_s9 }
 0x10b   : > { %659 = vrot.lane.b32.xlu1 %v1594_v10, %s1393_s9 }
 0x10e   : > { %722 = vrot.lane.b32.xlu0 %v535_v16, %s1390_s26 }
 0x10f   : > { %681 = vrot.lane.b32.xlu1 %v1603_v15, %s1392_s29 }
 0x112   : > { %705 = vrot.lane.b32.xlu0 %v535_v16, %s1394_s10 }
 0x113   : > { %736 = vrot.lane.b32.xlu1 %v535_v16, %s1395_s11 }
 0x116   : > { %749 = vrot.lane.b32.xlu0 %v533_v19, %s1393_s9 }
 0x117   : > { %718 = vrot.lane.b32.xlu1 %v533_v19, %s1390_s26 }
 0x11a   : > { %732 = vrot.lane.b32.xlu0 %v533_v19, %s1395_s11 }
 0x11b   : > { %751 = vrot.lane.b32.xlu1 %v534_v21, %s1393_s9 }
 0x11e   : > { %701 = vrot.lane.b32.xlu0 %v533_v19, %s1394_s10 }
 0x11f   : > { %734 = vrot.lane.b32.xlu1 %v534_v21, %s1395_s11 }
 0x122   : > { %720 = vrot.lane.b32.xlu0 %v534_v21, %s1390_s26 }
 0x123   : > { %703 = vrot.lane.b32.xlu1 %v534_v21, %s1394_s10 }
 0x126   : > { %589 = vrot.lane.b32.xlu0 %v1576_v54, %s1391_s28  ;;  %s242_s28 = sand.u32 1, %s1375_s22  }
 0x127   : > { %543 = vrot.lane.b32.xlu1 %v1564_v43, %s1390_s26 }
 0x12a   : > { %545 = vrot.lane.b32.xlu0 %v1571_v50, %s1390_s26 }
 0x12b   : > { %547 = vrot.lane.b32.xlu1 %v1561_v40, %s1390_s26  ;;  %s1327_s26 = sshll.u32 %s1398_s20, 4  ;;  %s1328_s26 = int_to_ptr.vmem [resolvable:$false] %s1327_s26 }
 0x12e   : > { %821 = vrot.lane.b32.xlu0 %v535_v16, %s1396_s12 }
 0x12f   : > { %801 = vrot.lane.b32.xlu1 %v533_v19, %s1388_s19 }
 0x132   : > { %817 = vrot.lane.b32.xlu0 %v533_v19, %s1396_s12 }
 0x133   : > { %786 = vrot.lane.b32.xlu1 %v535_v16, %s1397_s13 }
 0x136   : > { %805 = vrot.lane.b32.xlu0 %v535_v16, %s1388_s19 }
 0x137   : > { %819 = vrot.lane.b32.xlu1 %v534_v21, %s1396_s12 }
 0x13a   : > { %782 = vrot.lane.b32.xlu0 %v533_v19, %s1397_s13 }
 0x13b   : > { %803 = vrot.lane.b32.xlu1 %v534_v21, %s1388_s19  ;;  %s1329_s19 = scalar_lea.vmem %s1328_s26, 3840 }
 0x13e   : > { %784 = vrot.lane.b32.xlu0 %v534_v21, %s1397_s13  ;;  %s1266_s13 = smul.u32 1920, %s1457_s25  ;;  %s1832_s25 = scalar_lea.sflag [#allocation4], %s242_s28 }
 0x13f   : > { %768 = vrot.lane.b32.xlu1 %v534_v21, %s1392_s29 }
 0x140   : > { %s1824_s17 = scalar_lea.hbm %s1878_s6, %s1266_s13 }
 0x142   : > { %770 = vrot.lane.b32.xlu0 %v535_v16, %s1392_s29 }
 0x143   : > { %766 = vrot.lane.b32.xlu1 %v533_v19, %s1392_s29  ;;  %s1264_s29 = smul.u32 120, %s242_s28 }
 0x145   : > { %s1798_s12 = scalar_lea.vmem [#allocation3], %s1264_s29 }
 0x146   : > { %265 = vperm.xlu0 %1321, %v258_v25   ;;  %s1153_s14 = sshll.u32 %s1798_s12, 4  ;;  %s1826_s14 = int_to_ptr.vmem [resolvable:$true] %s1153_s14 }
 0x147   : > { %910 = vperm.xlu1 %1322, %v904_v26   ;;  %s1323_s18 = scalar_lea.vmem %s1826_s14, 1920  ;;  %p1330_p0 = scmp.lt.s32.totalorder %s1826_s14, %s1328_s26 }
 0x148   : > { %p1324_p11 = scmp.ne.s32.totalorder %s1826_s14, %s1323_s18  ;;  %p1331_p1 = scmp.lt.s32.totalorder %s1329_s19, %s1323_s18 }
 0x14a   : > { %915 = vperm.xlu0 %1321, %v905_v27   ;;  %p1325_p12 = pnand %p1324_p11, %p1474_p5  ;;  %p1332_p2 = por %p1331_p1, %p1330_p0 }
 0x14b   : > { %920 = vperm.xlu1 %1322, %v906_v28  }
 0x14c   : > { %p1326_p13 = pneg %p1325_p12 }
 0x14e   : > { %925 = vperm.xlu0 %1321, %v907_v30   ;;  %p1333_p3 = pnand %p1332_p2, %p1326_p13 }
 0x158   : > { %v568_v31 = vpop.permute.xlu0 %567  ;;  %v564_v33 = vpop.permute.xlu1 %563 }
 0x159   : > { %581 = vst.msk [vmem:[#allocation2 + $0x68] sm:$0xff] %vm580_vm4, %v568_v31 }
 0x15c   : > { %v642_v34 = vpop.permute.xlu0 %641  ;;  %v566_v35 = vpop.permute.xlu1 %565 }
 0x15d   : > { %655 = vst.msk [vmem:[#allocation2 + $0x130] sm:$0xff] %vm654_vm5, %v642_v34  ;;  %v1669_v36 = vsel %vm569_vm6, %v564_v33, %v566_v35  ;;  %v1672_v37 = vsel %vm569_vm6, %v566_v35, %v568_v31  ;;  %vm744_vm5 = vcmask 1047688  }
 0x160   : > { %v626_v39 = vpop.permute.xlu0 %625  ;;  %v638_v40 = vpop.permute.xlu1 %637 }
 0x161   : > { %636 = vst.msk [vmem:[#allocation2 + $0x108] sm:$0xff] %vm580_vm4, %v626_v39 }
 0x164   : > { %v609_v41 = vpop.permute.xlu0 %608  ;;  %v622_v42 = vpop.permute.xlu1 %621 }
 0x168   : > { %v605_v44 = vpop.permute.xlu0 %604  ;;  %v640_v45 = vpop.permute.xlu1 %639 }
 0x169   : > { %615 = vst.msk [vmem:[#allocation2 + $0xa8] sm:$0xff] %vm555_vm7, %v605_v44  ;;  %v1676_v46 = vsel %vm643_vm8, %v638_v40, %v640_v45  ;;  %v1678_v47 = vsel %vm643_vm8, %v640_v45, %v642_v34  ;;  %vm713_vm8 = vcmask 1047704  }
 0x16c   : > { %v586_v48 = vpop.permute.xlu0 %585 }
 0x16d   : > { %599 = vst.msk [vmem:[#allocation2 + $0x80] sm:$0xff] %vm598_vm9, %v586_v48  ;;  %v624_v49 = vpop.permute.xlu1 %623  ;;  %vm738_vm9 = vcmask 138240  }
 0x16e   : > { %v1681_v51 = vsel %vm569_vm6, %v622_v42, %v624_v49  ;;  %v1684_v52 = vsel %vm569_vm6, %v624_v49, %v626_v39 }
 0x170   : > { %v684_v53 = vpop.permute.xlu0 %683 }
 0x171   : > { %697 = vst.msk [vmem:[#allocation2 + $0x1a8] sm:$0xff] %vm696_vm10, %v684_v53  ;;  %v607_v54 = vpop.permute.xlu1 %606 }
 0x172   : > { %v1688_v55 = vsel %vm549_vm11, %v605_v44, %v607_v54  ;;  %v611_v56 = vsel %vm549_vm11, %v607_v54, %v609_v41 }
 0x173   : > { %617 = vst.msk [vmem:[#allocation2 + $0xb8] sm:$0xff] %vm558_vm12, %v611_v56 }
 0x174   : > { %v664_v58 = vpop.permute.xlu0 %663 }
 0x175   : > { %v1692_v59 = vpop.permute.xlu1 %587 }
 0x176   : > { %v1696_v60 = vsel %vm591_vm13, %v586_v48, %v1692_v59 }
 0x178   : > { %v662_v61 = vpop.permute.xlu0 %661 }
 0x179   : > { %v667_v62 = vsel %vm665_vm14, %v662_v61, %v664_v58  ;;  %v680_v1 = vpop.permute.xlu1 %679 }
 0x17a   : > { %675 = vst.msk [vmem:[#allocation2 + $0x158] sm:$0xff] %vm674_vm15, %v667_v62  ;;  %v876_v62 = vld [vmem:[#allocation2 + $0x1a8] sm:$0xff] }
 0x17c   : > { %v754_v2 = vpop.permute.xlu0 %753 }
 0x17d   : > { %v660_v3 = vpop.permute.xlu1 %659 }
 0x17e   : > { %v1701_v4 = vsel %vm665_vm14, %v660_v3, %v662_v61  ;;  %672 = vst.msk [vmem:[#allocation2 + $0x148] sm:$0xff] %vm671_vm0, %v660_v3 }
 0x180   : > { %v723_v5 = vpop.permute.xlu0 %722 }
 0x181   : > { %v682_v6 = vpop.permute.xlu1 %681  ;;  %v870_v3 = vld [vmem:[#allocation2 + $0x158] sm:$0xff] }
 0x182   : > { %v686_v7 = vsel %vm685_vm1, %v680_v1, %v682_v6  ;;  %v687_v8 = vsel %vm685_vm1, %v682_v6, %v684_v53  ;;  %v873_v1 = vld [vmem:[#allocation2 + $0x180] sm:$0xff] }
 0x183   : > { %v861_v6 = vld [vmem:[#allocation2 + $0xe0] sm:$0xff] }
 0x184   : > { %v706_v9 = vpop.permute.xlu0 %705 }
 0x185   : > { %v737_v11 = vpop.permute.xlu1 %736  ;;  %v868_v61 = vld [vmem:[#allocation2 + $0x148] sm:$0xff] }
 0x188   : > { %v750_v12 = vpop.permute.xlu0 %749 }
 0x189   : > { %760 = vst.msk [vmem:[#allocation2 + $0x238] sm:$0xff] %vm671_vm0, %v750_v12  ;;  %v719_v13 = vpop.permute.xlu1 %718  ;;  %vm707_vm0 = vcmask 154624  }
 0x18a   : > { %729 = vst.msk [vmem:[#allocation2 + $0x1e8] sm:$0xff] %vm555_vm7, %v719_v13 }
 0x18c   : > { %v733_v14 = vpop.permute.xlu0 %732 }
 0x18d   : > { %745 = vst.msk [vmem:[#allocation2 + $0x210] sm:$0xff] %vm744_vm5, %v733_v14  ;;  %v752_v16 = vpop.permute.xlu1 %751  ;;  %vm716_vm5 = vcmask 1006592  }
 0x18e   : > { %v755_v19 = vsel %vm665_vm14, %v750_v12, %v752_v16  ;;  %v756_v20 = vsel %vm665_vm14, %v752_v16, %v754_v2 }
 0x18f   : > { %762 = vst.msk [vmem:[#allocation2 + $0x248] sm:$0xff] %vm674_vm15, %v756_v20  ;;  %943 = vmatprep.subr.mxu0 %v755_v19 }
 0x190   : > { %v702_v21 = vpop.permute.xlu0 %701  ;;  %v886_v22 = vld [vmem:[#allocation2 + $0x238] sm:$0xff] }
 0x191   : > { %714 = vst.msk [vmem:[#allocation2 + $0x1c0] sm:$0xff] %vm713_vm8, %v702_v21  ;;  %v735_v24 = vpop.permute.xlu1 %734  ;;  %944 = vmatpush1.msra.mxu0 %v886_v22  ;;  %v880_v40 = vld [vmem:[#allocation2 + $0x1e8] sm:$0xff]  ;;  %v836_v22 = vld [vmem:[%s1876_s4] sm:$0xff] }
 0x192   : > { %v739_v25 = vsel %vm738_vm9, %v733_v14, %v735_v24  ;;  %v740_v26 = vsel %vm738_vm9, %v735_v24, %v737_v11  ;;  %v849_v14 = vld [vmem:[#allocation2 + $0x40] sm:$0xff] }
 0x193   : > { %748 = vst.msk [vmem:[#allocation2 + $0x220] sm:$0xff] %vm747_vm2, %v740_v26  ;;  %945 = vmatprep.subr.mxu0 %v739_v25  ;;  %vm834_vm2 = vcmask 695296   ;;  %v839_v25 = vld [vmem:[%s1876_s4 + $0x18] sm:$0xff] }
 0x194   : > { %v721_v27 = vpop.permute.xlu0 %720  ;;  %v883_v28 = vld [vmem:[#allocation2 + $0x210] sm:$0xff] }
 0x195   : > { %v724_v30 = vsel %vm549_vm11, %v719_v13, %v721_v27  ;;  %v725_v31 = vsel %vm549_vm11, %v721_v27, %v723_v5  ;;  %v704_v33 = vpop.permute.xlu1 %703  ;;  %946 = vmatpush1.msra.mxu0 %v883_v28  ;;  %v852_v13 = vld [vmem:[#allocation2 + $0x68] sm:$0xff]  ;;  %v838_v28 = vld [vmem:[%s1876_s4 + $0x10] sm:$0xff] }
 0x196   : > { %731 = vst.msk [vmem:[#allocation2 + $0x1f8] sm:$0xff] %vm558_vm12, %v725_v31  ;;  %v708_v34 = vsel %vm707_vm0, %v702_v21, %v704_v33  ;;  %v709_v35 = vsel %vm707_vm0, %v704_v33, %v706_v9  ;;  %v888_v39 = vld [vmem:[#allocation2 + $0x248] sm:$0xff]  ;;  %947 = vmatprep.subr.mxu0 %v724_v30 }
 0x197   : > { %717 = vst.msk [vmem:[#allocation2 + $0x1d0] sm:$0xff] %vm716_vm5, %v709_v35  ;;  %1033 = vmatpush1.msra.mxu1 %v888_v39  ;;  %948 = vmatpush1.msra.mxu0 %v880_v40  ;;  %v841_v30 = vld [vmem:[%s1876_s4 + $0x28] sm:$0xff]  ;;  %v843_v35 = vld [vmem:[%s1876_s4 + $0x38] sm:$0xff] }
 0x198   : > { %v590_v41 = vpop.permute.xlu0 %589  ;;  %1034 = vmatprep.subr.mxu1 %v1385_v0  ;;  %949 = vmatprep.subr.mxu0 %v708_v34  ;;  %v877_v42 = vld [vmem:[#allocation2 + $0x1c0] sm:$0xff] }
 0x199   : > { %v1715_v44 = vsel %vm591_vm13, %v1692_v59, %v590_v41  ;;  %v544_v45 = vpop.permute.xlu1 %543  ;;  %950 = vmatpush1.msra.mxu0 %v877_v42  ;;  %v840_v34 = vld [vmem:[%s1876_s4 + $0x20] sm:$0xff] }
 0x19a   : > { %556 = vst.msk [vmem:[#allocation2 + $0x8] sm:$0xff] %vm555_vm7, %v544_v45  ;;  %v885_v48 = vld [vmem:[#allocation2 + $0x220] sm:$0xff]  ;;  %951 = vmatprep.subr.mxu0 %v687_v8  ;;  %vm799_vm7 = vcmask 711680   ;;  %v858_v8 = vld [vmem:[#allocation2 + $0xb8] sm:$0xff] }
 0x19b   : > { %1035 = vmatpush1.msra.mxu1 %v885_v48  ;;  %952 = vmatpush1.msra.mxu0 %v686_v7 }
 0x19c   : > { %v546_v49 = vpop.permute.xlu0 %545  ;;  %1036 = vmatprep.subr.mxu1 %v1385_v0  ;;  %953 = vmatprep.subr.mxu0 %v1603_v15 }
 0x19d   : > { %v1721_v53 = vsel %vm549_vm11, %v544_v45, %v546_v49  ;;  %v548_v54 = vpop.permute.xlu1 %547  ;;  %v882_v56 = vld [vmem:[#allocation2 + $0x1f8] sm:$0xff]  ;;  %954 = vmatpush1.msra.mxu0 %v1594_v10 }
 0x19e   : > { %v551_v58 = vsel %vm549_vm11, %v546_v49, %v548_v54  ;;  %1037 = vmatpush1.msra.mxu1 %v882_v56  ;;  %v879_v59 = vld [vmem:[#allocation2 + $0x1d0] sm:$0xff]  ;;  %955 = vmatprep.subr.mxu0 %v1701_v4  ;;  %vm823_vm11 = vcmask 891904   ;;  %v864_v4 = vld [vmem:[#allocation2 + $0x108] sm:$0xff] }
 0x19f   : > { %559 = vst.msk [vmem:[#allocation2 + $0x18] sm:$0xff] %vm558_vm12, %v551_v58  ;;  %1038 = vmatprep.subr.mxu1 %v1385_v0  ;;  %956 = vmatpush1.msra.mxu0 %v868_v61 }
 0x1a0   : > { %v822_v15 = vpop.permute.xlu0 %821  ;;  %1039 = vmatpush1.msra.mxu1 %v879_v59  ;;  %957 = vmatprep.subr.mxu0 %v1678_v47 }
 0x1a1   : > { %835 = vst.msk [vmem:[#allocation2 + $0x310] sm:$0xff] %vm834_vm2, %v822_v15  ;;  %1040 = vmatprep.subr.mxu1 %v1385_v0  ;;  %v802_v10 = vpop.permute.xlu1 %801  ;;  %958 = vmatpush1.msra.mxu0 %v1676_v46  ;;  %v856_v46 = vld [vmem:[#allocation2 + $0xa8] sm:$0xff] }
 0x1a2   : > { %1041 = vmatpush1.msra.mxu1 %v876_v62  ;;  %959 = vmatprep.subr.mxu0 %v1684_v52  ;;  %v867_v52 = vld [vmem:[#allocation2 + $0x130] sm:$0xff] }
 0x1a3   : > { %1042 = vmatprep.subr.mxu1 %v1385_v0  ;;  %960 = vmatpush1.msra.mxu0 %v1681_v51 }
 0x1a4   : > { %v818_v2 = vpop.permute.xlu0 %817  ;;  %1043 = vmatpush1.msra.mxu1 %v873_v1  ;;  %961 = vmatprep.subr.mxu0 %v1586_v63  ;;  %v853_v63 = vld [vmem:[#allocation2 + $0x80] sm:$0xff] }
 0x1a5   : > { %1044 = vmatprep.subr.mxu1 %v1385_v0  ;;  %v787_v47 = vpop.permute.xlu1 %786  ;;  %962 = vmatpush1.msra.mxu0 %v1579_v57 }
 0x1a6   : > { %800 = vst.msk [vmem:[#allocation2 + $0x2c0] sm:$0xff] %vm799_vm7, %v787_v47  ;;  %1045 = vmatpush1.msra.mxu1 %v870_v3  ;;  %963 = vmatprep.subr.mxu0 %v1688_v55  ;;  %v846_v21 = vld [vmem:[#allocation2 + $0x18] sm:$0xff] }
 0x1a7   : > { %1046 = vmatprep.subr.mxu1 %v1385_v0  ;;  %964 = vmatpush1.msra.mxu0 %v856_v46 }
 0x1a8   : > { %v806_v51 = vpop.permute.xlu0 %805  ;;  %1047 = vmatpush1.msra.mxu1 %v867_v52  ;;  %965 = vmatprep.subr.mxu0 %v1696_v60  ;;  %v903_v26 = vld [vmem:[#allocation2 + $0x310] sm:$0xff] }
 0x1a9   : > { %816 = vst.msk [vmem:[#allocation2 + $0x2e8] sm:$0xff] %vm580_vm4, %v806_v51  ;;  %1048 = vmatprep.subr.mxu1 %v1385_v0  ;;  %v820_v57 = vpop.permute.xlu1 %819  ;;  %966 = vmatpush1.msra.mxu0 %v853_v63  ;;  %vm788_vm4 = vcmask 908288  }
 0x1aa   : > { %v824_v5 = vsel %vm823_vm11, %v818_v2, %v820_v57  ;;  %v825_v55 = vsel %vm823_vm11, %v820_v57, %v822_v15  ;;  %1049 = vmatpush1.msra.mxu1 %v864_v4  ;;  %967 = vmatprep.subr.mxu0 %v1672_v37  ;;  %v844_v37 = vld [vmem:[#allocation2 + $0x8] sm:$0xff] }
 0x1ab   : > { %1050 = vmatprep.subr.mxu1 %v1385_v0  ;;  %968 = vmatpush1.msra.mxu0 %v1669_v36 }
 0x1ac   : > { %v783_v7 = vpop.permute.xlu0 %782  ;;  %1051 = vmatpush1.msra.mxu1 %v861_v6  ;;  %969 = vmatprep.subr.mxu0 %v1571_v50 }
 0x1ad   : > { %1052 = vmatprep.subr.mxu1 %v1385_v0  ;;  %v804_v60 = vpop.permute.xlu1 %803  ;;  %970 = vmatpush1.msra.mxu0 %v1564_v43  ;;  %v897_v31 = vld [vmem:[#allocation2 + $0x2c0] sm:$0xff] }
 0x1ae   : > { %v807_v9 = vsel %vm569_vm6, %v802_v10, %v804_v60  ;;  %v808_v11 = vsel %vm569_vm6, %v804_v60, %v806_v51  ;;  %1053 = vmatpush1.msra.mxu1 %v858_v8  ;;  %971 = vmatprep.subr.mxu0 %v1721_v53  ;;  %vm1882_vm6 = vcmask 850944  }
 0x1af   : > { %1054 = vmatprep.subr.mxu1 %v1385_v0  ;;  %972 = vmatpush1.msra.mxu0 %v844_v37 }
 0x1b0   : > { %v785_v36 = vpop.permute.xlu0 %784  ;;  %1055 = vmatpush1.msra.mxu1 %v1715_v44  ;;  %997 = vmatprep.subr.mxu0 %v825_v55  ;;  %v900_v27 = vld [vmem:[#allocation2 + $0x2e8] sm:$0xff] }
 0x1b1   : > { %v789_v50 = vsel %vm788_vm4, %v783_v7, %v785_v36  ;;  %v790_v12 = vsel %vm788_vm4, %v785_v36, %v787_v47  ;;  %1056 = vmatprep.subr.mxu1 %v1385_v0  ;;  %v769_v43 = vpop.permute.xlu1 %768  ;;  %998 = vmatpush2.msra.mxu0 %v824_v5 }
 0x1b2   : > { %1057 = vmatpush1.msra.mxu1 %v852_v13  ;;  %999 = vmatprep.subr.mxu0 %v808_v11 }
 0x1b3   : > { %1058 = vmatprep.subr.mxu1 %v1385_v0  ;;  %1000 = vmatpush2.msra.mxu0 %v807_v9 }
 0x1b4   : > { %v771_v16 = vpop.permute.xlu0 %770  ;;  %1059 = vmatpush1.msra.mxu1 %v849_v14  ;;  %1001 = vmatprep.subr.mxu0 %v790_v12 }
 0x1b5   : > { %v773_v19 = vsel %vm685_vm1, %v769_v43, %v771_v16  ;;  %781 = vst.msk [vmem:[#allocation2 + $0x298] sm:$0xff] %vm696_vm10, %v771_v16  ;;  %1060 = vmatprep.subr.mxu1 %v1385_v0  ;;  %v767_v20 = vpop.permute.xlu1 %766  ;;  %1002 = vmatpush2.msra.mxu0 %v789_v50 }
 0x1b6   : > { %v772_v24 = vsel %vm685_vm1, %v767_v20, %v769_v43  ;;  %1061 = vmatpush1.msra.mxu1 %v846_v21  ;;  %1003 = vmatprep.subr.mxu0 %v773_v19 }
 0x1b7   : > { %1086 = vmatprep.subr.mxu1 %v1385_v0  ;;  %1004 = vmatpush2.msra.mxu0 %v772_v24 }
 0x1b8   : > { %1087 = vmatpush2.msra.mxu1 %v903_v26  ;;  %1006 = vmatmul.mubr.f32.vlgmr.msra.gmra.mxu0 %v836_v22 }
 0x1b9   : > { %1088 = vmatprep.subr.mxu1 %v1385_v0  ;;  %1231 = vmatprep.mubr.msk.f32.mxu0 %vm928_vm3, %v839_v25 }
 0x1ba   : > { %1089 = vmatpush2.msra.mxu1 %v900_v27 }
 0x1bb   : > { %1090 = vmatprep.subr.mxu1 %v1385_v0 }
 0x1bc   : > { %1091 = vmatpush2.msra.mxu1 %v897_v31  ;;  %v894_v33 = vld [vmem:[#allocation2 + $0x298] sm:$0xff]  ;;  %1012 = vmatmul.mubr.f32.gmra.mxu0 %v838_v28 }
 0x1bd   : > { %1092 = vmatprep.subr.mxu1 %v1385_v0  ;;  %1232 = vmatprep.mubr.msk.f32.mxu0 %vm928_vm3, %v841_v30  ;;  %v842_v0 = vld [vmem:[%s1876_s4 + $0x30] sm:$0xff] }
 0x1be   : > { %1093 = vmatpush2.msra.mxu1 %v894_v33 }
 0x1bf   : > { %1095 = vmatmul.mubr.f32.vlgmr.msra.gmra.mxu1 %v836_v22 }
 0x1c0   : > { %1235 = vmatprep.mubr.msk.f32.mxu1 %vm928_vm3, %v839_v25  ;;  %1018 = vmatmul.mubr.f32.gmra.mxu0 %v840_v34 }
 0x1c1   : > { %v266_v39 = vpop.permute.xlu0 %265  ;;  %1233 = vmatprep.mubr.msk.f32.mxu0 %vm928_vm3, %v843_v35 }
 0x1c2   : > { %v371_v40 = vadd.f32 %v1545_v18, %v266_v39  ;;  %v373_v41 = vadd.f32 %v1550_v23, %v266_v39  ;;  %v466_v42 = vadd.f32 %v1543_v17, %v266_v39  ;;  %v911_v17 = vpop.permute.xlu1 %910 }
 0x1c3   : > { %1100 = vmatmul.mubr.f32.gmra.mxu1 %v838_v28 }
 0x1c4   : > { %v489_v44 = vmax.f32 %v371_v40, 0.0  ;;  %v490_v45 = vmax.f32 %v373_v41, 0.0  ;;  %v491_v48 = vmax.f32 %v466_v42, 0.0  ;;  %1236 = vmatprep.mubr.msk.f32.mxu1 %vm928_vm3, %v841_v30  ;;  %1024 = vmatmul.mubr.f32.gmra.mxu0 %v842_v0 }
 0x1c5   : > { %v916_v56 = vpop.permute.xlu0 %915 }
 0x1c6   : > { %v521_v49 = vmul.f32 %v1556_v32, %v489_v44  ;;  %v522_v53 = vmul.f32 %v1558_v38, %v490_v45  ;;  %v523_v54 = vmul.f32 %v1554_v29, %v491_v48  ;;  %v921_v2 = vpop.permute.xlu1 %920 }
 0x1c7   : > { %1105 = vmatmul.mubr.f32.gmra.mxu1 %v840_v34 }
 0x1c8   : > { %536 = vst [vmem:[%s1798_s12] sm:$0xff] %v521_v49  ;;  %537 = vst [vmem:[%s1798_s12 + $0x8] sm:$0xff] %v522_v53  ;;  %1237 = vmatprep.mubr.msk.f32.mxu1 %vm928_vm3, %v843_v35 }
 0x1c9   : > { %539 = vst.msk [vmem:[%s1798_s12 + $0x10] sm:$0xff] %vm1882_vm6, %v523_v54  ;;  %v926_v6 = vpop.permute.xlu0 %925  ;;  %vm1883_vm3 = vmmov %vm1882_vm6 }
 0x1ca   : > { %vm1884_vm10 = vmmov %vm1883_vm3 }
 0x1cb   : > { %1110 = vmatmul.mubr.f32.gmra.mxu1 %v842_v0  ;;  %vm1885_vm12 = vmmov %vm1883_vm3 }
 0x1cc   : > { %vm1886_vm13 = vmmov %vm1883_vm3 }
 0x278   : > { %v1007_v18 = vpop.f32.mrf.mxu0 }
 0x279   : > { %v1008_v23 = vadd.f32 %v1007_v18, %v911_v17 }
 0x27a   : > { %v1009_v32 = vpop.f32.mrf.mxu0 }
 0x27b   : > { %v1115_v29 = vmax.f32 %v1008_v23, 0.0  ;;  %v1010_v38 = vadd.f32 %v1009_v32, %v911_v17 }
 0x27c   : > { %v1013_v58 = vpop.f32.mrf.mxu0 }
 0x27d   : > { %1127 = vst [vmem:[%s1798_s12 + $0x18] sm:$0xff] %v1115_v29  ;;  %v1116_v59 = vmax.f32 %v1010_v38, 0.0  ;;  %v1014_v61 = vadd.f32 %v1013_v58, %v916_v56 }
 0x27e   : > { %v1015_v15 = vpop.f32.mrf.mxu0 }
 0x27f   : > { %v1096_v10 = vpop.f32.mrf.mxu1  ;;  %1128 = vst [vmem:[%s1798_s12 + $0x20] sm:$0xff] %v1116_v59  ;;  %v1118_v62 = vmax.f32 %v1014_v61, 0.0  ;;  %v1016_v1 = vadd.f32 %v1015_v15, %v916_v56 }
 0x280   : > { %v1097_v47 = vadd.f32 %v1096_v10, %v911_v17  ;;  %v1019_v3 = vpop.f32.mrf.mxu0 }
 0x281   : > { %v1098_v46 = vpop.f32.mrf.mxu1  ;;  %1130 = vst [vmem:[%s1798_s12 + $0x30] sm:$0xff] %v1118_v62  ;;  %v1119_v52 = vmax.f32 %v1016_v1, 0.0  ;;  %v1020_v51 = vadd.f32 %v1019_v3, %v921_v2 }
 0x282   : > { %v1117_v63 = vmax.f32 %v1097_v47, 0.0  ;;  %v1021_v57 = vpop.f32.mrf.mxu0 }
 0x283   : > { %v1101_v4 = vpop.f32.mrf.mxu1  ;;  %1131 = vst [vmem:[%s1798_s12 + $0x38] sm:$0xff] %v1119_v52  ;;  %v1121_v5 = vmax.f32 %v1020_v51, 0.0  ;;  %v1022_v55 = vadd.f32 %v1021_v57, %v921_v2 }
 0x284   : > { %1129 = vst.msk [vmem:[%s1798_s12 + $0x28] sm:$0xff] %vm1883_vm3, %v1117_v63  ;;  %v1102_v7 = vadd.f32 %v1101_v4, %v916_v56  ;;  %v1025_v60 = vpop.f32.mrf.mxu0 }
 0x285   : > { %v1103_v8 = vpop.f32.mrf.mxu1  ;;  %1133 = vst [vmem:[%s1798_s12 + $0x48] sm:$0xff] %v1121_v5  ;;  %v1122_v9 = vmax.f32 %v1022_v55, 0.0  ;;  %v1026_v11 = vadd.f32 %v1025_v60, %v926_v6 }
 0x286   : > { %v1120_v37 = vmax.f32 %v1102_v7, 0.0  ;;  %v1027_v36 = vpop.f32.mrf.mxu0 }
 0x287   : > { %v1106_v50 = vpop.f32.mrf.mxu1  ;;  %1134 = vst [vmem:[%s1798_s12 + $0x50] sm:$0xff] %v1122_v9  ;;  %v1124_v12 = vmax.f32 %v1026_v11, 0.0  ;;  %v1028_v43 = vadd.f32 %v1027_v36, %v926_v6 }
 0x288   : > { %1132 = vst.msk [vmem:[%s1798_s12 + $0x40] sm:$0xff] %vm1884_vm10, %v1120_v37  ;;  %v1107_v13 = vadd.f32 %v1106_v50, %v921_v2 }
 0x289   : > { %v1108_v14 = vpop.f32.mrf.mxu1  ;;  %1136 = vst [vmem:[%s1798_s12 + $0x60] sm:$0xff] %v1124_v12  ;;  %v1125_v16 = vmax.f32 %v1028_v43, 0.0 }
 0x28a   : > { %v1123_v19 = vmax.f32 %v1107_v13, 0.0 }
 0x28b   : > { %v1111_v20 = vpop.f32.mrf.mxu1  ;;  %1137 = vst [vmem:[%s1798_s12 + $0x68] sm:$0xff] %v1125_v16 }
 0x28c   : > { %1135 = vst.msk [vmem:[%s1798_s12 + $0x58] sm:$0xff] %vm1885_vm12, %v1123_v19  ;;  %v1112_v21 = vadd.f32 %v1111_v20, %v926_v6 }
 0x28d   : > { %v1113_v22 = vpop.f32.mrf.mxu1 }
 0x28e   : > { %v1126_v24 = vmax.f32 %v1112_v21, 0.0 }
 0x290   : > { %1138 = vst.msk [vmem:[%s1798_s12 + $0x70] sm:$0xff] %vm1886_vm13, %v1126_v24 }
 0x291   : > { %1336 = shalt.err (!%p1333_p3)
}
 0x292   : > { %s1337_s28 = scalar_lea.hbm %s1824_s17, 1920  ;;  %s1341_s10 = scalar_lea.hbm %s1878_s6, 3840 }
 0x293   : > { %p1338_p4 = scmp.ne.s32.totalorder %s1824_s17, %s1337_s28  ;;  %p1342_p9 = scmp.lt.s32.totalorder %s1824_s17, %s1878_s6 }
 0x294   : > { %p1343_p10 = scmp.lt.s32.totalorder %s1341_s10, %s1337_s28 }
 0x295   : > { %p1339_p7 = pnand %p1338_p4, %p1474_p5 }
 0x296   : > { %p1344_p11 = por %p1343_p10, %p1342_p9 }
 0x297   : > { %p1340_p8 = pneg %p1339_p7 }
 0x299   : > { %p1345_p12 = pnand %p1344_p11, %p1340_p8 }
 0x29b   : > { %1348 = shalt.err (!%p1345_p12)
}
 0x29c   : > { %s1399_s13 = smov 384   ;;  %s1400_s15 = smov 24  }
 0x29d   : > { %1267 = dma.vmem_to_hbm [thread:$0]  (%p1474_p5), %s1826_s14, 1920, %s1824_s17, %s1832_s25, %s1399_s13, %s1399_s13, %s1400_s15  }
 0x29e PF: > { %p1273_p13 = scmp.ge.s32.totalorder %s1383_s24, 2  ;;  %s1168_s16 = sand.u32 1, %s1371_s21  }
 0x29f   : > { %s1169_s18 = scalar_lea.sflag [#allocation4], %s1168_s16 }
 0x2a0   : > { %p1270_p0 = pnand %p1273_p13, %p1478_p6 }
 0x2a2   : > { %p1271_p1 = pneg %p1270_p0 }
 0x2a4   : > { %1366 = dma.done.wait (%p1271_p1), %s1169_s18, 1920  }
 0x2a5   : > { %1368 = vsyncadd (%p1271_p1), %s1169_s18, 4294965376  ;;  %p16_p2 = scmp.ge.s32.totalorder %s1461_s27, 4   ;;  %s1887_s21 = smov %s1375_s22 }
 0x2a6   : > { %s1888_s22 = smov %s1379_s23  ;;  %s1889_s23 = smov %s1472_s30 }
 0x2a7   : > { %s1890_s24 = smov %s1461_s27  ;;  %18 = sbr.rel (!%p16_p2) target bundleno = 3 (0x3), region = 79 }
 0x2ac   :  { %1174 = vsyncpa [#allocation4], 1 }
 0x2ad   :  { %1176 = vsyncpa [#allocation4 + $0x1], 1 }

</bundles_post_ra>
